<compile_context>
chip_gen: v5e
topology: v5e:2x2
jax: 0.10.0
libtpu: 0.0.40
codegen_flags: <defaults>
</compile_context>

<pallas_src>
import functools

import jax
import jax.numpy as jnp
from jax import lax
from jax.experimental import pallas as pl
from jax.experimental.pallas import tpu as pltpu


def _round_up(x, m):
    return ((x + m - 1) // m) * m


def _pick_tile_m(m, n, in_bytes, tile_m=None):
    """Row-tile size (multiple of 8).

    The budget covers the double-buffered native-dtype input block plus ~6
    live (TM, N) f32/int32 temporaries inside the kernel, kept under the
    32 MiB scoped-VMEM limit requested below (fits v5e/v6e/v7x).  Also capped
    so the row grid has >= 2 blocks whenever M allows it, so v7x can shard the
    "parallel" axis across its two TensorCores.
    """
    if tile_m is None:
        budget = 20 << 20
        per_row = n * (2 * in_bytes + 6 * 4) + 64
        tile_m = (budget // per_row) // 8 * 8
        tile_m = int(max(8, min(1024, tile_m)))
        tile_m = min(tile_m, max(8, _round_up(-(-m // 2), 8)))   # >= 2 blocks
    tile_m = max(8, (int(tile_m) // 8) * 8)
    tile_m = min(tile_m, _round_up(m, 8))
    return tile_m


def _smcl_kernel(tgt_ref, x_ref, o_ref, *, delta, num_hard, m_total,
                 key_bits, use_radix):
    tm, n = x_ref.shape
    tgt = tgt_ref[...]                                    # (TM, 1) int32
    xf = x_ref[...].astype(jnp.float32)                   # (TM, N)

    col = lax.broadcasted_iota(jnp.int32, (tm, n), 1)
    pos_mask = col == tgt                                 # one-hot rebuilt in-kernel

    # ---- positive term: exactly one positive per row -----------------------
    # TODO(synk): out-of-range targets give (0-1)^2 = 1 here instead of the
    # reference's NaN / index error; targets are assumed to lie in [0, N).
    pos_val = jnp.sum(jnp.where(pos_mask, xf, 0.0), axis=1, keepdims=True)
    pos_term = (pos_val - 1.0) ** 2                       # (TM, 1)

    k_f = jnp.float32(num_hard)

    if not use_radix:
        # Small k: unrolled masked-max extraction (tie-exact; ~2 cross-lane
        # reductions per extracted value).
        neg_inf = jnp.float32(-jnp.inf)
        neg = jnp.where(pos_mask, neg_inf, xf)

        def extract(_, carry):
            neg_c, acc, remaining = carry
            mval = jnp.max(neg_c, axis=1, keepdims=True)
            eq = neg_c == mval
            cnt = jnp.sum(eq.astype(jnp.float32), axis=1, keepdims=True)
            take = jnp.minimum(cnt, remaining)
            sq = jnp.where(mval == neg_inf, 0.0, (mval + 1.0) ** 2)  # no 0*inf
            return (jnp.where(eq, neg_inf, neg_c), acc + take * sq,
                    remaining - take)

        _, hard_sum, _ = lax.fori_loop(
            0, num_hard, extract,
            (neg,
             jnp.zeros((tm, 1), jnp.float32),
             jnp.full((tm, 1), float(num_hard), jnp.float32)),
            unroll=True)
    else:
        # Large k: exact per-row k-th largest negative via monotone threshold
        # bisection on an order-preserving int key.  One sign-bit count plus
        # (key_bits - 1) masked counts; counts in f32 (exact for N < 2^24).
        i32 = pltpu.bitcast(xf, jnp.int32)
        if key_bits == 16:
            # bf16 inputs: top 16 bits of the upcast f32 pattern are the bf16
            # pattern -> 16-bit key, half the counting passes.
            s = jnp.right_shift(i32, 16)                  # sign-extended bf16 bits
            key = s ^ (jnp.right_shift(s, 31) & jnp.int32(0x7FFF))
        else:
            key = i32 ^ (jnp.right_shift(i32, 31) & jnp.int32(0x7FFFFFFF))
        sentinel = jnp.int32(-(1 << (key_bits - 1)))      # below every real key
        key = jnp.where(pos_mask, sentinel, key)          # exclude the positive

        # Decide the sign bit of the threshold, then bisect the low bits.
        cnt0 = jnp.sum((key >= 0).astype(jnp.float32), axis=1, keepdims=True)
        p0 = jnp.where(cnt0 >= k_f, jnp.int32(0), sentinel)

        def bisect(_, carry):
            p, bit = carry
            cand = p | bit
            cnt = jnp.sum((key >= cand).astype(jnp.float32), axis=1,
                          keepdims=True)
            return jnp.where(cnt >= k_f, cand, p), jnp.right_shift(bit, 1)

        p_final, _ = lax.fori_loop(
            0, key_bits - 1, bisect,
            (p0, jnp.int32(1 << (key_bits - 2))),
            unroll=4)

        # p_final is exactly the key of the num_hard-th largest negative.
        t_val = jnp.max(jnp.where(key == p_final, xf, -jnp.inf),
                        axis=1, keepdims=True)            # its float value
        gt = key > p_final
        cnt_gt = jnp.sum(gt.astype(jnp.float32), axis=1, keepdims=True)
        sq = (xf + 1.0) ** 2
        sum_gt = jnp.sum(jnp.where(gt, sq, 0.0), axis=1, keepdims=True)
        hard_sum = sum_gt + (k_f - cnt_gt) * (t_val + 1.0) ** 2

    per_row = (jnp.float32(delta) * pos_term
               + hard_sum * jnp.float32(1.0 / num_hard))  # (TM, 1)

    # Mask rows past the true M (no host-side padding) and emit a single
    # lane-dense partial-sum tile for this row block.
    row = lax.broadcasted_iota(jnp.int32, (tm, 1), 0) + pl.program_id(0) * tm
    per_row = jnp.where(row < m_total, per_row, 0.0)
    block_sum = jnp.sum(per_row, keepdims=True)           # (1, 1)
    o_ref[...] = jnp.zeros(o_ref.shape, jnp.float32) + block_sum


def smcl_loss(inputs, targets, delta=5.0, gamma=0.01, tile_m=None):
    """inputs: (M, N) float32/bfloat16 logits; targets: (M,) int class ids."""
    m, n = inputs.shape
    num_neg = n - 1                        # exactly one positive per row
    num_hard = int(gamma * num_neg)        # matches int(self.gamma * neg.size(0))
    assert 1 <= num_hard <= num_neg, "need 1 <= int(gamma*(n-1)) <= n-1"
    assert n < (1 << 24), "f32 lane counts stay exact only for n < 2^24"

    in_bytes = jnp.dtype(inputs.dtype).itemsize
    tm = _pick_tile_m(m, n, in_bytes, tile_m)
    num_blocks = -(-m // tm)               # cdiv; partial last block masked in-kernel

    # 16-bit selection key for bf16 inputs; crossover re-derived accordingly.
    key_bits = 16 if inputs.dtype == jnp.bfloat16 else 32
    use_radix = num_hard > (8 if key_bits == 16 else 16)

    kernel = functools.partial(
        _smcl_kernel, delta=float(delta), num_hard=num_hard, m_total=m,
        key_bits=key_bits, use_radix=use_radix)

    partials = pl.pallas_call(
        kernel,
        out_shape=jax.ShapeDtypeStruct((num_blocks, 8, 128), jnp.float32),
        grid=(num_blocks,),
        in_specs=[
            pl.BlockSpec((tm, 1), lambda i: (i, 0)),     # targets column
            pl.BlockSpec((tm, n), lambda i: (i, 0)),     # logits row tile (native dtype)
        ],
        out_specs=pl.BlockSpec((1, 8, 128), lambda i: (i, 0, 0)),
        compiler_params=pltpu.CompilerParams(
            dimension_semantics=("parallel",),
            vmem_limit_bytes=32 * 1024 * 1024),
    )(targets.astype(jnp.int32).reshape(m, 1), inputs)

    return jnp.sum(partials[:, 0, 0]) / jnp.float32(m)


def smcl_ref(inputs, targets, delta=5.0, gamma=0.01):
    """Vectorized pure-JAX reference mirroring the PyTorch per-row loop."""
    m, n = inputs.shape
    num_hard = int(gamma * (n - 1))
    x = inputs.astype(jnp.float32)
    onehot = jax.nn.one_hot(targets, n) > 0.5
    pos = jnp.sum(jnp.where(onehot, x, 0.0), axis=1)
    neg = jnp.where(onehot, -jnp.inf, x)
    top, _ = lax.top_k(neg, num_hard)
    per_row = delta * (pos - 1.0) ** 2 + jnp.mean((top + 1.0) ** 2, axis=1)
    return jnp.mean(per_row)


if __name__ == "__main__":
    key = jax.random.PRNGKey(0)
    k1, k2 = jax.random.split(key)

    M, N = 80, 256
    x = jax.random.normal(k1, (M, N), dtype=jnp.float32)
    t = jax.random.randint(k2, (M,), 0, N, dtype=jnp.int32)
    xb = x.astype(jnp.bfloat16)

    # Covers both select paths, both key widths, a partial last row block
    # (80 % 32 != 0) and the auto tile-size path.
    cases = [
        (x, 0.01, 32, 1e-4),      # k=2  : unrolled masked-max extraction
        (x, 0.10, 32, 1e-4),      # k=25 : 32-bit threshold bisection
        (x, 0.10, None, 1e-4),    # k=25 : auto tile -> 2 row blocks
        (xb, 0.05, 32, 1e-3),     # k=12 : bf16 -> 16-bit key bisection
        (xb, 0.01, None, 1e-3),   # k=2  : bf16 extraction path
    ]
    for xi, gamma, tmi, atol in cases:
        got = smcl_loss(xi, t, delta=5.0, gamma=gamma, tile_m=tmi)
        jax.block_until_ready(got)
        want = smcl_ref(xi, t, delta=5.0, gamma=gamma)
        assert jnp.allclose(got, want, atol=atol, rtol=1e-4), (
            str(xi.dtype), gamma, got, want)

    print("KERNEL_OK")
</pallas_src>

<mosaic_0001>
module attributes {stable_mosaic.version = 11 : i64} {
  func.func @_smcl_kernel(%arg0: i32, %arg1: memref<32x1xi32, #tpu.memory_space<vmem>>, %arg2: memref<32x256xf32, #tpu.memory_space<vmem>>, %arg3: memref<1x8x128xf32, #tpu.memory_space<vmem>>) attributes {dimension_semantics = [#tpu.dimension_semantics<parallel>], iteration_bounds = array<i64: 3>, scalar_prefetch = 0 : i64, scratch_operands = 0 : i64, tpu.core_type = #tpu.core_type<tc>, window_params = [{transform_indices = @transform_0, window_bounds = array<i64: 32, 1>}, {transform_indices = @transform_1, window_bounds = array<i64: 32, 256>}, {transform_indices = @transform_2, window_bounds = array<i64: 1, 8, 128>}]} {
    %c0 = arith.constant 0 : index
    %c0_0 = arith.constant 0 : index
    %0 = vector.load %arg1[%c0, %c0_0] : memref<32x1xi32, #tpu.memory_space<vmem>>, vector<32x1xi32>
    %c0_1 = arith.constant 0 : index
    %c0_2 = arith.constant 0 : index
    %1 = vector.load %arg2[%c0_1, %c0_2] : memref<32x256xf32, #tpu.memory_space<vmem>>, vector<32x256xf32>
    %2 = tpu.iota {dimensions = array<i32: 1>} : vector<32x256xi32>
    %3 = vector.broadcast %0 : vector<32x1xi32> to vector<32x256xi32>
    %4 = arith.cmpi eq, %2, %3 : vector<32x256xi32>
    %cst = arith.constant 0.000000e+00 : f32
    %5 = vector.broadcast %cst : f32 to vector<32x256xf32>
    %6 = arith.select %4, %1, %5 : vector<32x256xi1>, vector<32x256xf32>
    %cst_3 = arith.constant dense<0.000000e+00> : vector<32xf32>
    %7 = vector.multi_reduction <add>, %6, %cst_3 [1] : vector<32x256xf32> to vector<32xf32>
    %8 = vector.shape_cast %7 : vector<32xf32> to vector<32x1xf32>
    %cst_4 = arith.constant 1.000000e+00 : f32
    %9 = vector.broadcast %cst_4 : f32 to vector<32x1xf32>
    %10 = arith.subf %8, %9 : vector<32x1xf32>
    %11 = arith.mulf %10, %10 : vector<32x1xf32>
    %cst_5 = arith.constant 0xFF800000 : f32
    %12 = vector.broadcast %cst_5 : f32 to vector<32x256xf32>
    %13 = arith.select %4, %12, %1 : vector<32x256xi1>, vector<32x256xf32>
    %cst_6 = arith.constant 0.000000e+00 : f32
    %14 = vector.broadcast %cst_6 : f32 to vector<32x1xf32>
    %cst_7 = arith.constant 2.000000e+00 : f32
    %15 = vector.broadcast %cst_7 : f32 to vector<32x1xf32>
    %cst_8 = arith.constant 0xFF800000 : f32
    %c0_i32 = arith.constant 0 : i32
    %cst_9 = arith.constant dense<0xFF800000> : vector<32xf32>
    %16 = vector.multi_reduction <maximumf>, %13, %cst_9 [1] : vector<32x256xf32> to vector<32xf32>
    %17 = vector.shape_cast %16 : vector<32xf32> to vector<32x1xf32>
    %18 = vector.broadcast %17 : vector<32x1xf32> to vector<32x256xf32>
    %19 = arith.cmpf oeq, %13, %18 : vector<32x256xf32>
    %20 = arith.extui %19 : vector<32x256xi1> to vector<32x256xi32>
    %21 = arith.sitofp %20 : vector<32x256xi32> to vector<32x256xf32>
    %cst_10 = arith.constant dense<0.000000e+00> : vector<32xf32>
    %22 = vector.multi_reduction <add>, %21, %cst_10 [1] : vector<32x256xf32> to vector<32xf32>
    %23 = vector.shape_cast %22 : vector<32xf32> to vector<32x1xf32>
    %24 = arith.minimumf %23, %15 : vector<32x1xf32>
    %25 = vector.broadcast %cst_8 : f32 to vector<32x1xf32>
    %26 = arith.cmpf oeq, %17, %25 : vector<32x1xf32>
    %cst_11 = arith.constant 1.000000e+00 : f32
    %27 = vector.broadcast %cst_11 : f32 to vector<32x1xf32>
    %28 = arith.addf %17, %27 : vector<32x1xf32>
    %29 = arith.mulf %28, %28 : vector<32x1xf32>
    %cst_12 = arith.constant 0.000000e+00 : f32
    %30 = vector.broadcast %cst_12 : f32 to vector<32x1xf32>
    %31 = arith.select %26, %30, %29 : vector<32x1xi1>, vector<32x1xf32>
    %32 = vector.broadcast %cst_8 : f32 to vector<32x256xf32>
    %33 = arith.select %19, %32, %13 : vector<32x256xi1>, vector<32x256xf32>
    %34 = arith.mulf %24, %31 : vector<32x1xf32>
    %35 = arith.addf %14, %34 : vector<32x1xf32>
    %36 = arith.subf %15, %24 : vector<32x1xf32>
    %c1_i32 = arith.constant 1 : i32
    %cst_13 = arith.constant dense<0xFF800000> : vector<32xf32>
    %37 = vector.multi_reduction <maximumf>, %33, %cst_13 [1] : vector<32x256xf32> to vector<32xf32>
    %38 = vector.shape_cast %37 : vector<32xf32> to vector<32x1xf32>
    %39 = vector.broadcast %38 : vector<32x1xf32> to vector<32x256xf32>
    %40 = arith.cmpf oeq, %33, %39 : vector<32x256xf32>
    %41 = arith.extui %40 : vector<32x256xi1> to vector<32x256xi32>
    %42 = arith.sitofp %41 : vector<32x256xi32> to vector<32x256xf32>
    %cst_14 = arith.constant dense<0.000000e+00> : vector<32xf32>
    %43 = vector.multi_reduction <add>, %42, %cst_14 [1] : vector<32x256xf32> to vector<32xf32>
    %44 = vector.shape_cast %43 : vector<32xf32> to vector<32x1xf32>
    %45 = arith.minimumf %44, %36 : vector<32x1xf32>
    %46 = vector.broadcast %cst_8 : f32 to vector<32x1xf32>
    %47 = arith.cmpf oeq, %38, %46 : vector<32x1xf32>
    %cst_15 = arith.constant 1.000000e+00 : f32
    %48 = vector.broadcast %cst_15 : f32 to vector<32x1xf32>
    %49 = arith.addf %38, %48 : vector<32x1xf32>
    %50 = arith.mulf %49, %49 : vector<32x1xf32>
    %cst_16 = arith.constant 0.000000e+00 : f32
    %51 = vector.broadcast %cst_16 : f32 to vector<32x1xf32>
    %52 = arith.select %47, %51, %50 : vector<32x1xi1>, vector<32x1xf32>
    %53 = vector.broadcast %cst_8 : f32 to vector<32x256xf32>
    %54 = arith.select %40, %53, %33 : vector<32x256xi1>, vector<32x256xf32>
    %55 = arith.mulf %45, %52 : vector<32x1xf32>
    %56 = arith.addf %35, %55 : vector<32x1xf32>
    %57 = arith.subf %36, %45 : vector<32x1xf32>
    %cst_17 = arith.constant 5.000000e+00 : f32
    %58 = vector.broadcast %cst_17 : f32 to vector<32x1xf32>
    %59 = arith.mulf %58, %11 : vector<32x1xf32>
    %cst_18 = arith.constant 5.000000e-01 : f32
    %60 = vector.broadcast %cst_18 : f32 to vector<32x1xf32>
    %61 = arith.mulf %56, %60 : vector<32x1xf32>
    %62 = arith.addf %59, %61 : vector<32x1xf32>
    %63 = tpu.iota {dimensions = array<i32: 0>} : vector<32x1xi32>
    %c32_i32 = arith.constant 32 : i32
    %64 = arith.muli %arg0, %c32_i32 : i32
    %65 = vector.broadcast %64 : i32 to vector<32x1xi32>
    %66 = arith.addi %63, %65 : vector<32x1xi32>
    %c80_i32 = arith.constant 80 : i32
    %67 = vector.broadcast %c80_i32 : i32 to vector<32x1xi32>
    %68 = arith.cmpi slt, %66, %67 : vector<32x1xi32>
    %cst_19 = arith.constant 0.000000e+00 : f32
    %69 = vector.broadcast %cst_19 : f32 to vector<32x1xf32>
    %70 = arith.select %68, %62, %69 : vector<32x1xi1>, vector<32x1xf32>
    %71 = vector.shape_cast %70 : vector<32x1xf32> to vector<1x32x1xf32>
    %cst_20 = arith.constant dense<0.000000e+00> : vector<1xf32>
    %72 = vector.multi_reduction <add>, %71, %cst_20 [1, 2] : vector<1x32x1xf32> to vector<1xf32>
    %73 = vector.shape_cast %72 : vector<1xf32> to vector<1x1x1xf32>
    %74 = vector.extract %73[0, 0, 0] : f32 from vector<1x1x1xf32>
    %75 = vector.broadcast %74 : f32 to vector<1x1xf32>
    %cst_21 = arith.constant 0.000000e+00 : f32
    %76 = vector.broadcast %cst_21 : f32 to vector<1x8x128xf32>
    %77 = vector.shape_cast %75 : vector<1x1xf32> to vector<1x1x1xf32>
    %78 = vector.broadcast %77 : vector<1x1x1xf32> to vector<1x8x128xf32>
    %79 = arith.addf %76, %78 : vector<1x8x128xf32>
    %c0_22 = arith.constant 0 : index
    %c0_23 = arith.constant 0 : index
    %c0_24 = arith.constant 0 : index
    %80 = vector.load %arg3[%c0_22, %c0_23, %c0_24] : memref<1x8x128xf32, #tpu.memory_space<vmem>>, vector<1x8x128xf32>
    tpu.vector_store %arg3[%c0_22, %c0_23, %c0_24], %79 {strides = array<i32>} : memref<1x8x128xf32, #tpu.memory_space<vmem>>, vector<1x8x128xf32>,
    return
  }
  func.func @transform_0(%arg0: i32) -> (i32, i32) {
    %c0_i32 = arith.constant 0 : i32
    %c0_i32_0 = arith.constant 0 : i32
    return %arg0, %c0_i32 : i32, i32
  }
  func.func @transform_1(%arg0: i32) -> (i32, i32) {
    %c0_i32 = arith.constant 0 : i32
    %c0_i32_0 = arith.constant 0 : i32
    return %arg0, %c0_i32 : i32, i32
  }
  func.func @transform_2(%arg0: i32) -> (i32, i32, i32) {
    %c0_i32 = arith.constant 0 : i32
    %c0_i32_0 = arith.constant 0 : i32
    %c0_i32_1 = arith.constant 0 : i32
    return %arg0, %c0_i32, %c0_i32_0 : i32, i32, i32
  }
}

</mosaic_0001>

<bundles_post_ra>
// kernel: tpu_custom_call.1
= control target key start
LH: loop header
LB: loop body
LE: loop exit
PB: predicated region body
PF: predicated region fallthrough
CT: control target
= control target key end

     0   :  { %7 = vsyncpa [#allocation3], 0  ;;  %s1122_s0 = inlined_call_operand.vmem [shape: s32[80,1], index: 0, kind: input, shape index: {}]   ;;  %s1123_s1 = inlined_call_operand.hbm [shape: f32[80,256], index: 1, kind: input, shape index: {}]   ;;  %s1124_s2 = inlined_call_operand.hbm [shape: f32[3,8,128], index: 2, kind: output, shape index: {}]  }
   0x1   :  { %9 = vsyncpa [#allocation3 + $0x1], 0 }
   0x2   :  { %10 = vsyncpa [#allocation4], 0 }
   0x3   :  { %12 = vsyncpa [#allocation4 + $0x1], 0  ;;  %s825_s9 = smov 0   ;;  %s827_s10 = smov 0  }
   0x4   :  { %s829_s11 = smov 0   ;;  %s831_s12 = smov 0  }
   0x5 LB: > { %s846_s13 = sadd.s32 4294967295, %s803_s12   ;;  %s605_s14 = sadd.s32 4294967294, %s803_s12   ;;  %s803_s12 = sphi %s831_s12, %s1132_s12   ;;  %s799_s11 = sphi %s829_s11, %s1131_s11   ;;  %s795_s10 = sphi %s827_s10, %s1130_s10   ;;  %s791_s9 = sphi %s825_s9, %s1129_s9  }
   0x6   : > { %s850_s15 = sadd.s32 1, %s803_s12   ;;  %s51_s16 = sadd.s32 1, %s799_s11 }
   0x7   : > { %s48_s17 = ssub.s32 %s803_s12, %s850_s15  ;;  %p58_p0 = scmp.ne.s32.totalorder %s799_s11, %s795_s10 }
   0x8   : > { %p49_p1 = scmp.eq.s32.totalorder %s48_s17, 0  ;;  %p59_p2 = scmp.eq.s32.totalorder %s803_s12, 0 }
   0x9   : > { %p64_p3 = scmp.ne.s32.totalorder %s795_s10, %s791_s9  ;;  %p65_p4 = scmp.eq.s32.totalorder %s846_s13, 0 }
   0xa   : > { %s862_s18 = scalar_select %p49_p1, %s799_s11, %s51_s16  }
   0xb   : > { %p60_p5 = por %p59_p2, %p58_p0  ;;  %p864_p6 = por %p65_p4, %p64_p3 }
   0xc   : > { %p88_p7 = scmp.eq.s32.totalorder %s846_s13, 2  ;;  %p94_p8 = scmp.eq.s32.totalorder %s605_s14, 2 }
   0xd   : > { %p607_p11 = scmp.ge.s32.totalorder %s803_s12, 3 }
   0xe   : > { %p869_p9 = por %p88_p7, %p58_p0  ;;  %p873_p10 = por %p94_p8, %p64_p3 }
   0xf   : > { %110 = sbr.rel (%p607_p11) target bundleno = 56 (0x38), region = 16 }
  0x14   : > { %130 = sbr.rel (!%p60_p5) target bundleno = 56 (0x38), region = 24  ;;  %s131_s22 = sand.u32 (%p60_p5), 1, %s799_s11  }
  0x15   : > { %s609_s23 = sshll.u32 (%p60_p5), %s803_s12, 2  ;;  %s608_s24 = sshll.u32 (%p60_p5), %s131_s22, 6 }
  0x16   : > { %s137_s25 = ssub.s32 (%p60_p5), 10, %s609_s23  ;;  %s883_s29 = scalar_lea.sflag (%p60_p5), [#allocation3], %s131_s22 }
  0x17   : > { %p138_p12 = scmp.lt.s32.totalorder (%p60_p5), %s137_s25, 4  ;;  %s135_s30 = scalar_lea.vmem (%p60_p5), [#allocation2], %s608_s24 }
  0x19   : > { %s1134_s25 = smov (!%p138_p12, %s137_s25), 4 }
  0x1a   : > { %s647_s26 = sshll.u32 %s1134_s25, 4 }
  0x1b   : > { %s142_s27 = ssub.s32 64, %s647_s26 }
  0x1c   : > { %s143_s28 = sshll.u32 %s142_s27, 4 }
  0x1d   : > { %144 = vsyncadd %s883_s29, %s143_s28  ;;  %p886_p13 = scmp.ne.s32.totalorder %s647_s26, 0  ;;  %s649_s4 = sshll.u32 %s803_s12, 6 }
  0x1e   : > { %s148_s7 = scalar_lea.hbm %s1123_s1, %s649_s4  ;;  %s894_s8 = sshll.u32 %s135_s30, 4  ;;  %s153_s8 = int_to_ptr.vmem [resolvable:$true] %s894_s8 }
  0x1f   : > { %s150_s14 = sshll.u32 %s148_s7, 4  ;;  %s616_s16 = sshll.u32 %s1134_s25, 8  ;;  %s897_s14 = int_to_ptr.hbm [resolvable:$true] %s150_s14 }
  0x20   : > { %s698_s17 = sshra.s32 %s897_s14, 4  ;;  %s700_s22 = sshrl.u32 %s616_s16, 4  ;;  %s699_s17 = int_to_ptr.hbm [resolvable:$true] %s698_s17 }
  0x21   : > { %s705_s23 = scalar_lea.hbm %s699_s17, %s700_s22  ;;  %s709_s27 = scalar_lea.hbm %s1123_s1, 160 }
  0x22   : > { %p706_p0 = scmp.ne.s32.totalorder %s699_s17, %s705_s23  ;;  %p710_p3 = scmp.lt.s32.totalorder %s699_s17, %s1123_s1 }
  0x23   : > { %p711_p4 = scmp.lt.s32.totalorder %s709_s27, %s705_s23 }
  0x24   : > { %p707_p1 = pnand %p706_p0, %p886_p13 }
  0x25   : > { %p712_p5 = por %p711_p4, %p710_p3 }
  0x26   : > { %p708_p2 = pneg %p707_p1 }
  0x28   : > { %p713_p7 = pnand %p712_p5, %p708_p2 }
  0x2a   : > { %716 = shalt.err (!%p713_p7)
}
  0x2b   : > { %s717_s4 = sshra.s32 %s153_s8, 4  ;;  %s805_s6 = smov [#allocation2]   ;;  %s718_s4 = int_to_ptr.vmem [resolvable:$true] %s717_s4 }
  0x2c   : > { %s724_s5 = scalar_lea.vmem %s718_s4, %s700_s22  ;;  %s728_s7 = scalar_lea.vmem %s805_s6, 128 }
  0x2d   : > { %p725_p8 = scmp.ne.s32.totalorder %s718_s4, %s724_s5  ;;  %p730_p0 = scmp.lt.s32.totalorder %s728_s7, %s724_s5 }
  0x2f   : > { %p726_p11 = pnand %p725_p8, %p886_p13 }
  0x31   : > { %p727_p12 = pneg %p726_p11 }
  0x33   : > { %p732_p1 = pnand %p730_p0, %p727_p12 }
  0x35   : > { %735 = shalt.err (!%p732_p1)
}
  0x36   : > { %s806_s17 = smov 256   ;;  %s807_s23 = smov 16  }
  0x37   : > { %158 = dma.hbm_to_vmem [thread:$0]  (%p886_p13), %s897_s14, %s616_s16, %s153_s8, %s883_s29, %s806_s17, %s806_s17, %s807_s23  }
  0x38 PF: > { %p617_p2 = scmp.ge.s32.totalorder %s803_s12, 1  ;;  %p160_p3 = scmp.lt.s32.totalorder %s803_s12, 4 }
  0x3a   : > { %p161_p4 = pnand %p617_p2, %p160_p3 }
  0x3b   : > { %s926_s22 = sand.u32 (!%p161_p4), 1, %s795_s10  }
  0x3c   : > { %164 = sbr.rel (%p161_p4) target bundleno = 768 (0x300), region = 28  ;;  %s618_s24 = sshll.u32 (!%p161_p4), %s926_s22, 6 }
  0x3d   : > { %s167_s26 = scalar_lea.sflag (!%p161_p4), [#allocation3], %s926_s22  ;;  %s930_s3 = scalar_lea.vmem (!%p161_p4), [#allocation2], %s618_s24 }
  0x41   : > { %782 = dma.done.wait (%p864_p6), %s167_s26, 1024  }
  0x42   : > { %784 = vsyncadd (%p864_p6), %s167_s26, 4294966272  ;;  %s620_s25 = sshll.u32 %s846_s13, 2  ;;  %v808_v0 = vmov 0   ;;  %v233_v5 = vlaneseq  ;;  %v229_v8 = vld [vmem:[%s930_s3 + $0x20] sm:$0xff]  ;;  %v230_v9 = vld [vmem:[%s930_s3 + $0x28] sm:$0xff]  ;;  %v809_v49 = vmov 0.0  }
  0x43   : > { %697 = vset.pattern.permute.xlu1 %v808_v0  ;;  %696 = vset.pattern.permute.xlu0 %v808_v0  ;;  %p206_p13 = scmp.lt.s32.totalorder %s620_s25, 9  ;;  %v225_v10 = vld [vmem:[%s930_s3] sm:$0xff]  ;;  %v226_v11 = vld [vmem:[%s930_s3 + $0x8] sm:$0xff]  ;;  %v231_v23 = vld [vmem:[%s930_s3 + $0x30] sm:$0xff]  ;;  %s642_s19 = sshll.u32 %s846_s13, 5 }
  0x44   : > { %v234_v6 = vand.u32 127, %v233_v5  ;;  %v232_v24 = vld [vmem:[%s930_s3 + $0x38] sm:$0xff]  ;;  %v227_v25 = vld [vmem:[%s930_s3 + $0x10] sm:$0xff]  ;;  %s619_s27 = sshll.u32 %s926_s22, 3  ;;  %s644_s28 = sshll.u32 %s846_s13, 3 }
  0x45   : > { %s1136_s25 = smov (!%p206_p13, %s620_s25), 9  ;;  %v228_v26 = vld [vmem:[%s930_s3 + $0x18] sm:$0xff]  ;;  %s518_s5 = scalar_lea.hbm %s1124_s2, %s644_s28 }
  0x46   : > { %s621_s29 = sshll.u32 %s1136_s25, 3  ;;  %v235_v7 = vadd.s32 128, %v234_v6  ;;  %s200_s6 = scalar_lea.vmem [#allocation5], %s619_s27 }
  0x47   : > { %s209_s16 = scalar_lea.vmem %s1122_s0, %s621_s29  ;;  %s520_s7 = sshll.u32 %s200_s6, 4  ;;  %s521_s7 = int_to_ptr.vmem [resolvable:$true] %s520_s7 }
  0x48   : > { %v223_v1 = vld [vmem:[%s209_s16 + $0x10] sm:$0xff]  ;;  %v221_v2 = vld [vmem:[%s209_s16] sm:$0xff]  ;;  %v224_v3 = vld [vmem:[%s209_s16 + $0x18] sm:$0xff]  ;;  %s522_s17 = sshll.u32 %s518_s5, 4  ;;  %s508_s24 = scalar_lea.sflag [#allocation4], %s926_s22  ;;  %s523_s17 = int_to_ptr.hbm [resolvable:$true] %s522_s17 }
  0x49   : > { %243 = vperm.xlu1 %697, %v223_v1   ;;  %237 = vperm.xlu0 %696, %v221_v2   ;;  %v222_v4 = vld [vmem:[%s209_s16 + $0x8] sm:$0xff]  ;;  %s751_s26 = sshra.s32 %s523_s17, 4  ;;  %s757_s29 = scalar_lea.hbm %s1124_s2, 24  ;;  %s752_s26 = int_to_ptr.hbm [resolvable:$true] %s751_s26 }
  0x4a   : > { %s753_s3 = scalar_lea.hbm %s752_s26, 8  ;;  %p758_p8 = scmp.lt.s32.totalorder %s752_s26, %s1124_s2 }
  0x4b   : > { %p754_p6 = scmp.ne.s32.totalorder %s752_s26, %s753_s3  ;;  %p759_p11 = scmp.lt.s32.totalorder %s757_s29, %s753_s3 }
  0x4d   : > { %p755_p5 = pnand %p754_p6, %p869_p9  ;;  %p760_p12 = por %p759_p11, %p758_p8 }
  0x4f   : > { %p756_p7 = pneg %p755_p5 }
  0x51   : > { %246 = vperm.xlu1 %697, %v224_v3   ;;  %240 = vperm.xlu0 %696, %v222_v4   ;;  %p761_p0 = pnand %p760_p12, %p756_p7 }
  0xbb   : > { %v244_v12 = vpop.permute.xlu1 %243  ;;  %v238_v13 = vpop.permute.xlu0 %237 }
  0xbc   : > { %vm252_vm0 = vcmp.eq.s32.totalorder %v234_v6, %v244_v12  ;;  %vm253_vm1 = vcmp.eq.s32.totalorder %v235_v7, %v244_v12  ;;  %vm248_vm2 = vcmp.eq.s32.totalorder %v234_v6, %v238_v13  ;;  %vm249_vm3 = vcmp.eq.s32.totalorder %v235_v7, %v238_v13 }
  0xbd   : > { %v945_v14 = vsel %vm252_vm0, -inf, %v229_v8  ;;  %v947_v15 = vsel %vm253_vm1, -inf, %v230_v9  ;;  %v950_v16 = vsel %vm248_vm2, -inf, %v225_v10  ;;  %v953_v17 = vsel %vm249_vm3, -inf, %v226_v11 }
  0xbe   : > { %v298_v18 = vmax.f32 %v945_v14, %v947_v15  ;;  %v292_v19 = vmax.f32 %v950_v16, %v953_v17  ;;  %v260_v20 = vsel %vm252_vm0, %v229_v8, 0.0  ;;  %v261_v21 = vsel %vm253_vm1, %v230_v9, 0.0 }
  0xbf   : > { %v270_v22 = vadd.f32 %v261_v21, %v260_v20  ;;  %v256_v41 = vsel %vm248_vm2, %v225_v10, 0.0  ;;  %v257_v42 = vsel %vm249_vm3, %v226_v11, 0.0 }
  0xc0   : > { %299 = vmax.xlane.f32.xlu0 %v298_v18  ;;  %293 = vmax.xlane.f32.xlu2 %v292_v19  ;;  %v264_v43 = vadd.f32 %v257_v42, %v256_v41 }
  0xc3   : > { %v247_v27 = vpop.permute.xlu1 %246  ;;  %v241_v28 = vpop.permute.xlu0 %240 }
  0xc4   : > { %vm254_vm4 = vcmp.eq.s32.totalorder %v234_v6, %v247_v27  ;;  %vm255_vm5 = vcmp.eq.s32.totalorder %v235_v7, %v247_v27  ;;  %vm250_vm6 = vcmp.eq.s32.totalorder %v234_v6, %v241_v28  ;;  %vm251_vm7 = vcmp.eq.s32.totalorder %v235_v7, %v241_v28 }
  0xc5   : > { %v290_v29 = vsel %vm254_vm4, -inf, %v231_v23  ;;  %v291_v30 = vsel %vm255_vm5, -inf, %v232_v24  ;;  %v286_v31 = vsel %vm250_vm6, -inf, %v227_v25  ;;  %v287_v32 = vsel %vm251_vm7, -inf, %v228_v26 }
  0xc6   : > { %v301_v33 = vmax.f32 %v290_v29, %v291_v30  ;;  %v295_v34 = vmax.f32 %v286_v31, %v287_v32  ;;  %v258_v35 = vsel %vm250_vm6, %v227_v25, 0.0  ;;  %v259_v36 = vsel %vm251_vm7, %v228_v26, 0.0 }
  0xc7   : > { %v267_v37 = vadd.f32 %v259_v36, %v258_v35  ;;  %v262_v38 = vsel %vm254_vm4, %v231_v23, 0.0  ;;  %v263_v39 = vsel %vm255_vm5, %v232_v24, 0.0 }
  0xc8   : > { %302 = vmax.xlane.f32.xlu1 %v301_v33  ;;  %296 = vmax.xlane.f32.xlu2 %v295_v34  ;;  %v963_v40 = vadd.f32 %v263_v39, %v262_v38 }
  0xd0   : > { %265 = vadd.xlane.f32.xlu1 %v264_v43 }
 0x133   : > { %v967_v44 = vpop.xlane.xlu2 %293  ;;  %v969_v45 = vpop.xlane.xlu0 %299 }
 0x134   : > { %vm304_vm8 = vcmp.eq.f32.partialorder %v950_v16, %v967_v44  ;;  %vm305_vm9 = vcmp.eq.f32.partialorder %v953_v17, %v967_v44  ;;  %vm308_vm10 = vcmp.eq.f32.partialorder %v945_v14, %v969_v45  ;;  %vm309_vm11 = vcmp.eq.f32.partialorder %v947_v15, %v969_v45 }
 0x135   : > { %v360_v46 = vsel %vm304_vm8, -inf, %v950_v16  ;;  %v361_v47 = vsel %vm305_vm9, -inf, %v953_v17  ;;  %v630_v50 = vsel %vm308_vm10, 1.0, %v809_v49  ;;  %v631_v51 = vsel %vm309_vm11, 1.0, %v809_v49 }
 0x136   : > { %v380_v48 = vmax.f32 %v360_v46, %v361_v47  ;;  %v334_v52 = vadd.f32 %v631_v51, %v630_v50  ;;  %v364_v61 = vsel %vm308_vm10, -inf, %v945_v14  ;;  %v365_v62 = vsel %vm309_vm11, -inf, %v947_v15 }
 0x137   : > { %v386_v63 = vmax.f32 %v364_v61, %v365_v62  ;;  %v626_v3 = vsel %vm304_vm8, 1.0, %v809_v49  ;;  %v627_v4 = vsel %vm305_vm9, 1.0, %v809_v49  ;;  %vm344_vm8 = vcmp.eq.f32.partialorder %v967_v44, -inf }
 0x138   : > { %381 = vmax.xlane.f32.xlu2 %v380_v48  ;;  %335 = vadd.xlane.f32.xlu0 %v334_v52  ;;  %v328_v6 = vadd.f32 %v627_v4, %v626_v3 }
 0x13b   : > { %v995_v53 = vpop.xlane.xlu1 %302  ;;  %v997_v54 = vpop.xlane.xlu2 %296 }
 0x13c   : > { %vm310_vm12 = vcmp.eq.f32.partialorder %v290_v29, %v995_v53  ;;  %vm311_vm13 = vcmp.eq.f32.partialorder %v291_v30, %v995_v53  ;;  %vm306_vm14 = vcmp.eq.f32.partialorder %v286_v31, %v997_v54  ;;  %vm307_vm15 = vcmp.eq.f32.partialorder %v287_v32, %v997_v54 }
 0x13d   : > { %v632_v55 = vsel %vm310_vm12, 1.0, %v809_v49  ;;  %v633_v56 = vsel %vm311_vm13, 1.0, %v809_v49  ;;  %v362_v58 = vsel %vm306_vm14, -inf, %v286_v31  ;;  %v363_v59 = vsel %vm307_vm15, -inf, %v287_v32 }
 0x13e   : > { %v337_v57 = vadd.f32 %v633_v56, %v632_v55  ;;  %v383_v60 = vmax.f32 %v362_v58, %v363_v59  ;;  %v366_v0 = vsel %vm310_vm12, -inf, %v290_v29  ;;  %v367_v1 = vsel %vm311_vm13, -inf, %v291_v30 }
 0x13f   : > { %v389_v2 = vmax.f32 %v366_v0, %v367_v1  ;;  %v628_v7 = vsel %vm306_vm14, 1.0, %v809_v49  ;;  %v629_v8 = vsel %vm307_vm15, 1.0, %v809_v49  ;;  %v348_v29 = vadd.f32 1.0, %v967_v44 }
 0x140   : > { %338 = vadd.xlane.f32.xlu1 %v337_v57  ;;  %384 = vmax.xlane.f32.xlu2 %v383_v60  ;;  %v331_v9 = vadd.f32 %v629_v8, %v628_v7  ;;  %v349_v39 = vadd.f32 1.0, %v997_v54  ;;  %v469_v44 = vshrl.u32 %v233_v5, 7  ;;  %vm345_vm10 = vcmp.eq.f32.partialorder %v997_v54, -inf }
 0x141   : > { %v352_v33 = vmul.f32 %v348_v29, %v348_v29  ;;  %vm346_vm12 = vcmp.eq.f32.partialorder %v969_v45, -inf }
 0x142   : > { %v353_v51 = vmul.f32 %v349_v39, %v349_v39 }
 0x143   : > { %v266_v31 = vpop.xlane.xlu1 %265 }
 0x144   : > { %v622_v42 = vadd.f32 -1.0, %v266_v31 }
 0x146   : > { %v280_v52 = vmul.f32 %v622_v42, %v622_v42 }
 0x148   : > { %271 = vadd.xlane.f32.xlu1 %v270_v22  ;;  %387 = vmax.xlane.f32.xlu2 %v386_v63 }
 0x150   : > { %390 = vmax.xlane.f32.xlu2 %v389_v2 }
 0x158   : > { %268 = vadd.xlane.f32.xlu2 %v267_v37 }
 0x160   : > { %329 = vadd.xlane.f32.xlu2 %v328_v6 }
 0x168   : > { %332 = vadd.xlane.f32.xlu2 %v331_v9 }
 0x1ab   : > { %v382_v10 = vpop.xlane.xlu2 %381  ;;  %v336_v37 = vpop.xlane.xlu0 %335 }
 0x1ac   : > { %vm392_vm0 = vcmp.eq.f32.partialorder %v360_v46, %v382_v10  ;;  %vm393_vm1 = vcmp.eq.f32.partialorder %v361_v47, %v382_v10  ;;  %v436_v30 = vadd.f32 1.0, %v382_v10  ;;  %vm432_vm9 = vcmp.eq.f32.partialorder %v382_v10, -inf }
 0x1ad   : > { %v634_v11 = vsel %vm392_vm0, 1.0, %v809_v49  ;;  %v635_v12 = vsel %vm393_vm1, 1.0, %v809_v49  ;;  %v342_v4 = vmin.f32 %v336_v37, 2.0  ;;  %vm487_vm0 = vcmask 7168  }
 0x1ae   : > { %v416_v13 = vadd.f32 %v635_v12, %v634_v11  ;;  %v440_v34 = vmul.f32 %v436_v30, %v436_v30  ;;  %vm347_vm1 = vcmp.eq.f32.partialorder %v995_v53, -inf }
 0x1b0   : > { %417 = vadd.xlane.f32.xlu2 %v416_v13  ;;  %v444_v41 = vsel %vm432_vm9, 0.0, %v440_v34 }
 0x1b3   : > { %v1041_v14 = vpop.xlane.xlu2 %384  ;;  %v1063_v43 = vpop.xlane.xlu1 %338 }
 0x1b4   : > { %vm394_vm2 = vcmp.eq.f32.partialorder %v362_v58, %v1041_v14  ;;  %vm395_vm3 = vcmp.eq.f32.partialorder %v363_v59, %v1041_v14  ;;  %v437_v46 = vadd.f32 1.0, %v1041_v14  ;;  %v1068_v58 = vstv %s642_s19 }
 0x1b5   : > { %v636_v15 = vsel %vm394_vm2, 1.0, %v809_v49  ;;  %v637_v16 = vsel %vm395_vm3, 1.0, %v809_v49  ;;  %v350_v59 = vadd.f32 1.0, %v969_v45  ;;  %vm433_vm11 = vcmp.eq.f32.partialorder %v1041_v14, -inf }
 0x1b6   : > { %v419_v17 = vadd.f32 %v637_v16, %v636_v15  ;;  %v441_v55 = vmul.f32 %v437_v46, %v437_v46  ;;  %v475_v5 = vadd.s32 %v1068_v58, %v469_v44  ;;  %v351_v45 = vadd.f32 1.0, %v995_v53 }
 0x1b7   : > { %v354_v9 = vmul.f32 %v350_v59, %v350_v59  ;;  %v343_v29 = vmin.f32 %v1063_v43, 2.0  ;;  %v472_v46 = vadd.s32 24, %v469_v44 }
 0x1b8   : > { %420 = vadd.xlane.f32.xlu0 %v419_v17  ;;  %v445_v3 = vsel %vm433_vm11, 0.0, %v441_v55  ;;  %vm479_vm13 = vcmp.lt.s32.totalorder %v475_v5, 80  ;;  %v378_v17 = vsub.f32 2.0, %v342_v4  ;;  %v355_v37 = vmul.f32 %v351_v45, %v351_v45 }
 0x1b9   : > { %v478_v53 = vadd.s32 %v1068_v58, %v472_v46 }
 0x1bb   : > { %v1047_v18 = vpop.xlane.xlu2 %387  ;;  %v272_v10 = vpop.xlane.xlu1 %271 }
 0x1bc   : > { %vm396_vm4 = vcmp.eq.f32.partialorder %v364_v61, %v1047_v18  ;;  %vm397_vm5 = vcmp.eq.f32.partialorder %v365_v62, %v1047_v18  ;;  %v470_v61 = vadd.s32 8, %v469_v44  ;;  %v357_v62 = vsel %vm345_vm10, 0.0, %v353_v51 }
 0x1bd   : > { %v638_v19 = vsel %vm396_vm4, 1.0, %v809_v49  ;;  %v639_v20 = vsel %vm397_vm5, 1.0, %v809_v49  ;;  %v438_v2 = vadd.f32 1.0, %v1047_v18  ;;  %v624_v14 = vadd.f32 -1.0, %v272_v10 }
 0x1be   : > { %v422_v21 = vadd.f32 %v639_v20, %v638_v19  ;;  %v476_v54 = vadd.s32 %v1068_v58, %v470_v61  ;;  %v358_v19 = vsel %vm346_vm12, 0.0, %v354_v9  ;;  %vm434_vm14 = vcmp.eq.f32.partialorder %v1047_v18, -inf }
 0x1bf   : > { %v442_v13 = vmul.f32 %v438_v2, %v438_v2  ;;  %v282_v30 = vmul.f32 %v624_v14, %v624_v14  ;;  %vm482_vm4 = vcmp.lt.s32.totalorder %v478_v53, 80 }
 0x1c0   : > { %423 = vadd.xlane.f32.xlu0 %v422_v21  ;;  %v471_v21 = vadd.s32 16, %v469_v44  ;;  %vm480_vm15 = vcmp.lt.s32.totalorder %v476_v54, 80 }
 0x1c1   : > { %v458_v39 = vmul.f32 5.0, %v282_v30 }
 0x1c2   : > { %v477_v18 = vadd.s32 %v1068_v58, %v471_v21 }
 0x1c3   : > { %v1053_v22 = vpop.xlane.xlu2 %390 }
 0x1c4   : > { %vm398_vm6 = vcmp.eq.f32.partialorder %v366_v0, %v1053_v22  ;;  %vm399_vm7 = vcmp.eq.f32.partialorder %v367_v1, %v1053_v22  ;;  %v456_v1 = vmul.f32 5.0, %v280_v52  ;;  %vm481_vm2 = vcmp.lt.s32.totalorder %v477_v18, 80 }
 0x1c5   : > { %v640_v23 = vsel %vm398_vm6, 1.0, %v809_v49  ;;  %v641_v24 = vsel %vm399_vm7, 1.0, %v809_v49  ;;  %vm435_vm3 = vcmp.eq.f32.partialorder %v1053_v22, -inf }
 0x1c6   : > { %v425_v25 = vadd.f32 %v641_v24, %v640_v23 }
 0x1c8   : > { %426 = vadd.xlane.f32.xlu2 %v425_v25  ;;  %274 = vadd.xlane.f32.xlu0 %v963_v40  ;;  %v356_v40 = vsel %vm344_vm8, 0.0, %v352_v33 }
 0x1cb   : > { %v269_v26 = vpop.xlane.xlu2 %268 }
 0x1cc   : > { %v623_v56 = vadd.f32 -1.0, %v269_v26  ;;  %v370_v26 = vmul.f32 %v358_v19, %v342_v4 }
 0x1ce   : > { %v281_v6 = vmul.f32 %v623_v56, %v623_v56 }
 0x1d0   : > { %v457_v15 = vmul.f32 5.0, %v281_v6 }
 0x1d3   : > { %v330_v27 = vpop.xlane.xlu2 %329 }
 0x1d4   : > { %v340_v32 = vmin.f32 %v330_v27, 2.0  ;;  %v439_v27 = vadd.f32 1.0, %v1053_v22 }
 0x1d6   : > { %v376_v35 = vsub.f32 2.0, %v340_v32  ;;  %v368_v47 = vmul.f32 %v356_v40, %v340_v32 }
 0x1db   : > { %v333_v28 = vpop.xlane.xlu2 %332 }
 0x1dc   : > { %v341_v49 = vmin.f32 %v333_v28, 2.0  ;;  %v446_v28 = vsel %vm434_vm14, 0.0, %v442_v13 }
 0x1de   : > { %v377_v57 = vsub.f32 2.0, %v341_v49  ;;  %v369_v7 = vmul.f32 %v357_v62, %v341_v49 }
 0x223   : > { %v418_v36 = vpop.xlane.xlu2 %417 }
 0x224   : > { %v428_v38 = vmin.f32 %v418_v36, %v376_v35 }
 0x226   : > { %v448_v48 = vmul.f32 %v444_v41, %v428_v38  ;;  %v443_v38 = vmul.f32 %v439_v27, %v439_v27  ;;  %v379_v41 = vsub.f32 2.0, %v343_v29 }
 0x228   : > { %v452_v50 = vadd.f32 %v448_v48, %v368_v47  ;;  %v447_v51 = vsel %vm435_vm3, 0.0, %v443_v38 }
 0x22a   : > { %v460_v63 = vmul.f32 0.5, %v452_v50  ;;  %v359_v50 = vsel %vm347_vm1, 0.0, %v355_v37 }
 0x22b   : > { %v421_v60 = vpop.xlane.xlu0 %420  ;;  %v371_v52 = vmul.f32 %v359_v50, %v343_v29 }
 0x22c   : > { %v429_v0 = vmin.f32 %v421_v60, %v377_v57  ;;  %v464_v11 = vadd.f32 %v460_v63, %v456_v1 }
 0x22e   : > { %v449_v8 = vmul.f32 %v445_v3, %v429_v0  ;;  %v483_v25 = vsel %vm479_vm13, %v464_v11, 0.0 }
 0x22f   : > { %v488_v33 = vsel %vm487_vm0, %v483_v25, 0.0 }
 0x230   : > { %v453_v12 = vadd.f32 %v449_v8, %v369_v7 }
 0x232   : > { %v461_v16 = vmul.f32 0.5, %v453_v12 }
 0x233   : > { %v424_v20 = vpop.xlane.xlu0 %423 }
 0x234   : > { %v465_v23 = vadd.f32 %v461_v16, %v457_v15  ;;  %v430_v24 = vmin.f32 %v424_v20, %v378_v17 }
 0x236   : > { %v450_v31 = vmul.f32 %v446_v28, %v430_v24  ;;  %v484_v32 = vsel %vm480_vm15, %v465_v23, 0.0 }
 0x237   : > { %v489_v34 = vsel %vm487_vm0, %v484_v32, 0.0 }
 0x238   : > { %v454_v35 = vadd.f32 %v450_v31, %v370_v26  ;;  %v490_v36 = vadd.f32 %v489_v34, %v488_v33 }
 0x23a   : > { %v462_v40 = vmul.f32 0.5, %v454_v35 }
 0x23b   : > { %v427_v42 = vpop.xlane.xlu2 %426  ;;  %v275_v43 = vpop.xlane.xlu0 %274 }
 0x23c   : > { %v466_v47 = vadd.f32 %v462_v40, %v458_v39  ;;  %v431_v48 = vmin.f32 %v427_v42, %v379_v41  ;;  %v625_v49 = vadd.f32 -1.0, %v275_v43 }
 0x23e   : > { %v451_v55 = vmul.f32 %v447_v51, %v431_v48  ;;  %v283_v56 = vmul.f32 %v625_v49, %v625_v49  ;;  %v485_v57 = vsel %vm481_vm2, %v466_v47, 0.0 }
 0x23f   : > { %v491_v59 = vsel %vm487_vm0, %v485_v57, 0.0 }
 0x240   : > { %v455_v60 = vadd.f32 %v451_v55, %v371_v52  ;;  %v492_v61 = vadd.f32 %v491_v59, %v490_v36  ;;  %v459_v44 = vmul.f32 5.0, %v283_v56 }
 0x242   : > { %v463_v62 = vmul.f32 0.5, %v455_v60 }
 0x244   : > { %v467_v22 = vadd.f32 %v463_v62, %v459_v44 }
 0x246   : > { %v486_v63 = vsel %vm482_vm4, %v467_v22, 0.0 }
 0x247   : > { %v493_v0 = vsel %vm487_vm0, %v486_v63, 0.0 }
 0x248   : > { %v494_v1 = vadd.f32 %v493_v0, %v492_v61 }
 0x24a   : > { %495 = vadd.xlane.f32.xlu1 %v494_v1 }
 0x2bd   : > { %v496_v2 = vpop.xlane.xlu1 %495 }
 0x2be   : > { %v497_v3 = vrot.slane %v496_v2, 4 }
 0x2c0   : > { %v498_v5 = vadd.f32 %v497_v3, %v496_v2 }
 0x2c2   : > { %v499_v4 = vrot.slane %v498_v5, 2 }
 0x2c4   : > { %v500_v58 = vadd.f32 %v499_v4, %v498_v5 }
 0x2c6   : > { %v501_v6 = vrot.slane %v500_v58, 1 }
 0x2c8   : > { %v502_v7 = vadd.f32 %v501_v6, %v500_v58 }
 0x2ca   : > { %650 = vpush %v502_v7 }
 0x2fb   : > { %s651_s23 = spop %650 }
 0x2fc   : > { %v504_v8 = vstv %s651_s23 }
 0x2fd   : > { %506 = vst [vmem:[%s200_s6] sm:$0xff] %v504_v8 }
 0x2fe   : > { %764 = shalt.err (!%p761_p0)
}
 0x2ff   : > { %653 = dma.vmem_to_hbm [thread:$0]  (%p869_p9), %s521_s7, 128, %s523_s17, %s508_s24  }
 0x300 PF: > { %p659_p1 = scmp.ge.s32.totalorder %s803_s12, 2  ;;  %s534_s22 = sand.u32 1, %s791_s9  }
 0x301   : > { %s535_s16 = scalar_lea.sflag [#allocation4], %s534_s22 }
 0x302   : > { %p656_p2 = pnand %p659_p1, %p873_p10 }
 0x304   : > { %p657_p3 = pneg %p656_p2 }
 0x306   : > { %786 = dma.done.wait (%p657_p3), %s535_s16, 128  }
 0x307   : > { %788 = vsyncadd (%p657_p3), %s535_s16, 4294967168  ;;  %p15_p4 = scmp.ge.s32.totalorder %s850_s15, 5   ;;  %s1129_s9 = smov %s795_s10 }
 0x308   : > { %s1130_s10 = smov %s799_s11  ;;  %s1131_s11 = smov %s862_s18 }
 0x309   : > { %s1132_s12 = smov %s850_s15  ;;  %17 = sbr.rel (!%p15_p4) target bundleno = 5 (0x5), region = 76 }
 0x30e   :  { %541 = vsyncpa [#allocation3], 1 }
 0x30f   :  { %543 = vsyncpa [#allocation3 + $0x1], 1 }
 0x310   :  { %544 = vsyncpa [#allocation4], 1 }
 0x311   :  { %546 = vsyncpa [#allocation4 + $0x1], 1 }

</bundles_post_ra>
